<compile_context>
chip_gen: v5e
topology: v5e:2x2
jax: 0.10.0
libtpu: 0.0.40
codegen_flags: <defaults>
</compile_context>

<pallas_src>
import math

import jax
import jax.numpy as jnp
from jax import lax
from jax.experimental import pallas as pl
from jax.experimental.pallas import tpu as pltpu


EMBED_DIM = 64
NUM_HEADS = 4
HEAD_DIM = EMBED_DIM // NUM_HEADS


def _feature_self_attention_kernel(x_ref, r_ref, c_ref, wc_ref, bc_ref, y_ref):
    """One batch element per grid step.

    x_ref : (1, L, 1)   features of one batch element (column layout)
    r_ref : (1, 3E)     rank-1 folded (input_proj ∘ MHA in_proj) weight row
    c_ref : (1, 3E)     folded bias row (attention scale folded into the q third)
    wc_ref: (1, E)      folded (MHA out_proj ∘ output_proj) weight row
    bc_ref: (1, 1)      folded output bias
    y_ref : (1, 1, L)   output row (lane-dense store)
    """
    f32 = jnp.float32
    E, Dh = EMBED_DIM, HEAD_DIM
    L = x_ref.shape[1]

    x_col = x_ref[0].astype(f32)                                    # [L, 1]

    # Linear(1,E) followed by the fused QKV projection == rank-1 affine map (VPU).
    qkv = x_col * r_ref[...].astype(f32) + c_ref[...].astype(f32)   # [L, 3E]

    q = qkv[:, :E]              # already scaled by 1/sqrt(Dh) via the wrapper fold
    k = qkv[:, E:2 * E]
    v = qkv[:, 2 * E:]

    wc = wc_ref[...].astype(f32)                                    # [1, E]
    contract_last = (((1,), (1,)), ((), ()))                        # a·bᵀ without transposes

    y_row = jnp.zeros((1, L), f32)
    for h in range(NUM_HEADS):                                      # static unroll (4 heads)
        sl = slice(h * Dh, (h + 1) * Dh)
        qh, kh, vh = q[:, sl], k[:, sl], v[:, sl]                   # [L, Dh] each

        # scores + numerically stable softmax over keys (keys on lanes)
        s = lax.dot_general(qh, kh, contract_last, preferred_element_type=f32)   # [L, L]
        s = s - jnp.max(s, axis=-1, keepdims=True)
        p = jnp.exp(s)
        p = p * pl.reciprocal(jnp.sum(p, axis=-1, keepdims=True), approx=True)

        # Folded output projection applied per head in row form:
        #   contribution = p @ (v_h @ w_comb_h)  ==  dot(dot(wc_h, v_hᵀ), pᵀ)
        z = lax.dot_general(wc[:, sl], vh, contract_last, preferred_element_type=f32)      # [1, L]
        y_row = y_row + lax.dot_general(z, p, contract_last, preferred_element_type=f32)   # [1, L]

    y_row = y_row + bc_ref[...].astype(f32)                         # broadcast [1, 1]
    y_ref[0] = y_row.astype(y_ref.dtype)


@jax.jit
def feature_self_attention(x, params):
    """Pallas forward of FeatureSelfAttention. x: [B, L] -> [B, L]."""
    B, L = x.shape
    E, Dh = EMBED_DIM, HEAD_DIM
    f32 = jnp.float32
    hi = lax.Precision.HIGHEST

    # ---- wrapper-side parameter folds (exact, weight-only; fused under jit) ----
    w_in = params["in_proj_w"].reshape(E).astype(f32)        # Linear(1,E).weight -> [E]
    b_in = params["in_proj_b"].astype(f32)                   # [E]
    in_w = params["mha_in_w"].astype(f32)                    # [3E, E]
    in_b = params["mha_in_b"].astype(f32)                    # [3E]

    r = jnp.dot(in_w, w_in, precision=hi)                    # [3E]  (= w_in @ in_w.T)
    c = jnp.dot(in_w, b_in, precision=hi) + in_b             # [3E]

    scale = 1.0 / math.sqrt(Dh)                              # fold attn scale into q third
    sc = jnp.concatenate([jnp.full((E,), scale, f32), jnp.ones((2 * E,), f32)])
    r = (r * sc).reshape(1, 3 * E)
    c = (c * sc).reshape(1, 3 * E)

    wo = params["mha_out_w"].astype(f32)                     # [E, E]
    bo = params["mha_out_b"].astype(f32)                     # [E]
    wout = params["out_proj_w"].astype(f32)                  # [1, E]
    bout = params["out_proj_b"].astype(f32)                  # [1]
    w_comb = jnp.dot(wout, wo, precision=hi)                 # [1, E]  = W_out @ W_o
    b_comb = (jnp.dot(wout[0], bo, precision=hi) + bout[0]).reshape(1, 1)

    # Layout plumbing: x as [B, L, 1] columns, y as [B, 1, L] lane-dense rows.
    x3 = x.reshape(B, L, 1)
    full = lambda shape: pl.BlockSpec(shape, lambda b: (0,) * len(shape))

    y3 = pl.pallas_call(
        _feature_self_attention_kernel,
        out_shape=jax.ShapeDtypeStruct((B, 1, L), x.dtype),
        grid=(B,),
        in_specs=[
            pl.BlockSpec((1, L, 1), lambda b: (b, 0, 0)),    # x
            full((1, 3 * E)),                                # r
            full((1, 3 * E)),                                # c
            full((1, E)),                                    # w_comb
            full((1, 1)),                                    # b_comb
        ],
        out_specs=pl.BlockSpec((1, 1, L), lambda b: (b, 0, 0)),
        compiler_params=pltpu.CompilerParams(
            dimension_semantics=("parallel",),               # shard batch over TCs (v7x)
        ),
    )(x3, r, c, w_comb, b_comb)

    return y3.reshape(B, L)


# ----------------------------- reference (pure JAX, unfused) -----------------------------

def _ref_forward(x, params):
    E, H, Dh = EMBED_DIM, NUM_HEADS, HEAD_DIM
    B, L = x.shape
    hi = jax.lax.Precision.HIGHEST

    h = x[..., None] * params["in_proj_w"].reshape(E) + params["in_proj_b"]   # [B, L, E]

    qkv = jnp.einsum("ble,fe->blf", h, params["mha_in_w"], precision=hi) + params["mha_in_b"]
    q, k, v = jnp.split(qkv, 3, axis=-1)

    def split_heads(t):
        return t.reshape(B, L, H, Dh).transpose(0, 2, 1, 3)                   # [B, H, L, Dh]

    qh, kh, vh = map(split_heads, (q, k, v))
    s = jnp.einsum("bhld,bhmd->bhlm", qh, kh, precision=hi) / math.sqrt(Dh)
    p = jax.nn.softmax(s, axis=-1)
    o = jnp.einsum("bhlm,bhmd->bhld", p, vh, precision=hi)
    o = o.transpose(0, 2, 1, 3).reshape(B, L, E)
    o = jnp.einsum("ble,fe->blf", o, params["mha_out_w"], precision=hi) + params["mha_out_b"]
    y = jnp.einsum("ble,fe->blf", o, params["out_proj_w"], precision=hi) + params["out_proj_b"]
    return y[..., 0]


if __name__ == "__main__":
    key = jax.random.PRNGKey(0)
    ks = jax.random.split(key, 10)

    B, L, E = 2, 16, EMBED_DIM

    # Deterministic parameters in PyTorch layouts.
    params = {
        "in_proj_w":  jax.random.normal(ks[0], (E, 1), jnp.float32) * 0.2,
        "in_proj_b":  jax.random.normal(ks[1], (E,), jnp.float32) * 0.1,
        "mha_in_w":   jax.random.normal(ks[2], (3 * E, E), jnp.float32) * (1.0 / math.sqrt(E)),
        "mha_in_b":   jax.random.normal(ks[3], (3 * E,), jnp.float32) * 0.1,
        "mha_out_w":  jax.random.normal(ks[4], (E, E), jnp.float32) * (1.0 / math.sqrt(E)),
        "mha_out_b":  jax.random.normal(ks[5], (E,), jnp.float32) * 0.1,
        "out_proj_w": jax.random.normal(ks[6], (1, E), jnp.float32) * (1.0 / math.sqrt(E)),
        "out_proj_b": jax.random.normal(ks[7], (1,), jnp.float32) * 0.1,
    }
    x = jax.random.normal(ks[8], (B, L), jnp.float32)

    y = feature_self_attention(x, params)
    jax.block_until_ready(y)

    y_ref = _ref_forward(x, params)
    assert y.shape == (B, L)
    assert jnp.allclose(y, y_ref, atol=2e-3, rtol=2e-3), \
        f"max abs diff = {jnp.max(jnp.abs(y - y_ref))}"

    print("KERNEL_OK")
</pallas_src>

<mosaic_0001>
module attributes {stable_mosaic.version = 11 : i64} {
  func.func @_feature_self_attention_kernel(%arg0: i32, %arg1: memref<1x16x1xf32, #tpu.memory_space<vmem>>, %arg2: memref<1x192xf32, #tpu.memory_space<vmem>>, %arg3: memref<1x192xf32, #tpu.memory_space<vmem>>, %arg4: memref<1x64xf32, #tpu.memory_space<vmem>>, %arg5: memref<1x1xf32, #tpu.memory_space<vmem>>, %arg6: memref<1x1x16xf32, #tpu.memory_space<vmem>>) attributes {dimension_semantics = [#tpu.dimension_semantics<parallel>], iteration_bounds = array<i64: 2>, scalar_prefetch = 0 : i64, scratch_operands = 0 : i64, tpu.core_type = #tpu.core_type<tc>, window_params = [{transform_indices = @transform_0, window_bounds = array<i64: 1, 16, 1>}, {pipeline_mode = #tpu.pipeline_mode<synchronous>, transform_indices = @transform_1, window_bounds = array<i64: 1, 192>}, {pipeline_mode = #tpu.pipeline_mode<synchronous>, transform_indices = @transform_2, window_bounds = array<i64: 1, 192>}, {pipeline_mode = #tpu.pipeline_mode<synchronous>, transform_indices = @transform_3, window_bounds = array<i64: 1, 64>}, {pipeline_mode = #tpu.pipeline_mode<synchronous>, transform_indices = @transform_4, window_bounds = array<i64: 1, 1>}, {transform_indices = @transform_5, window_bounds = array<i64: 1, 1, 16>}]} {
    %c0 = arith.constant 0 : index
    %c0_0 = arith.constant 0 : index
    %c0_1 = arith.constant 0 : index
    %0 = vector.load %arg1[%c0, %c0_0, %c0_1] : memref<1x16x1xf32, #tpu.memory_space<vmem>>, vector<1x16x1xf32>
    %1 = vector.shape_cast %0 : vector<1x16x1xf32> to vector<16x1xf32>
    %c0_2 = arith.constant 0 : index
    %c0_3 = arith.constant 0 : index
    %2 = vector.load %arg2[%c0_2, %c0_3] : memref<1x192xf32, #tpu.memory_space<vmem>>, vector<1x192xf32>
    %3 = vector.broadcast %1 : vector<16x1xf32> to vector<16x192xf32>
    %4 = vector.broadcast %2 : vector<1x192xf32> to vector<16x192xf32>
    %5 = arith.mulf %3, %4 : vector<16x192xf32>
    %c0_4 = arith.constant 0 : index
    %c0_5 = arith.constant 0 : index
    %6 = vector.load %arg3[%c0_4, %c0_5] : memref<1x192xf32, #tpu.memory_space<vmem>>, vector<1x192xf32>
    %7 = vector.broadcast %6 : vector<1x192xf32> to vector<16x192xf32>
    %8 = arith.addf %5, %7 : vector<16x192xf32>
    %9 = vector.extract_strided_slice %8 {offsets = [0, 0], sizes = [16, 64], strides = [1, 1]} : vector<16x192xf32> to vector<16x64xf32>
    %10 = vector.extract_strided_slice %8 {offsets = [0, 64], sizes = [16, 64], strides = [1, 1]} : vector<16x192xf32> to vector<16x64xf32>
    %11 = vector.extract_strided_slice %8 {offsets = [0, 128], sizes = [16, 64], strides = [1, 1]} : vector<16x192xf32> to vector<16x64xf32>
    %c0_6 = arith.constant 0 : index
    %c0_7 = arith.constant 0 : index
    %12 = vector.load %arg4[%c0_6, %c0_7] : memref<1x64xf32, #tpu.memory_space<vmem>>, vector<1x64xf32>
    %cst = arith.constant 0.000000e+00 : f32
    %13 = vector.broadcast %cst : f32 to vector<1x16xf32>
    %14 = vector.extract_strided_slice %9 {offsets = [0, 0], sizes = [16, 16], strides = [1, 1]} : vector<16x64xf32> to vector<16x16xf32>
    %15 = vector.extract_strided_slice %10 {offsets = [0, 0], sizes = [16, 16], strides = [1, 1]} : vector<16x64xf32> to vector<16x16xf32>
    %16 = vector.extract_strided_slice %11 {offsets = [0, 0], sizes = [16, 16], strides = [1, 1]} : vector<16x64xf32> to vector<16x16xf32>
    %cst_8 = arith.constant dense<0.000000e+00> : vector<16x16xf32>
    %17 = tpu.matmul %14, %15, %cst_8 {dimension_numbers = #tpu.dot_dimension_numbers<[1], [1], [0], [0], [0, 0, 1, 0], [], []>} : vector<16x16xf32>, vector<16x16xf32>, vector<16x16xf32> -> vector<16x16xf32>
    %cst_9 = arith.constant dense<0xFF800000> : vector<16xf32>
    %18 = vector.multi_reduction <maximumf>, %17, %cst_9 [1] : vector<16x16xf32> to vector<16xf32>
    %19 = vector.shape_cast %18 : vector<16xf32> to vector<16x1xf32>
    %20 = vector.broadcast %19 : vector<16x1xf32> to vector<16x16xf32>
    %21 = arith.subf %17, %20 : vector<16x16xf32>
    %22 = math.exp %21 : vector<16x16xf32>
    %cst_10 = arith.constant dense<0.000000e+00> : vector<16xf32>
    %23 = vector.multi_reduction <add>, %22, %cst_10 [1] : vector<16x16xf32> to vector<16xf32>
    %24 = vector.shape_cast %23 : vector<16xf32> to vector<16x1xf32>
    %25 = tpu.reciprocal %24 {approx = true} : vector<16x1xf32> -> vector<16x1xf32>
    %26 = vector.broadcast %25 : vector<16x1xf32> to vector<16x16xf32>
    %27 = arith.mulf %22, %26 : vector<16x16xf32>
    %28 = vector.extract_strided_slice %12 {offsets = [0, 0], sizes = [1, 16], strides = [1, 1]} : vector<1x64xf32> to vector<1x16xf32>
    %cst_11 = arith.constant dense<0.000000e+00> : vector<1x16xf32>
    %29 = tpu.matmul %28, %16, %cst_11 {dimension_numbers = #tpu.dot_dimension_numbers<[1], [1], [0], [0], [0, 0, 1, 0], [], []>} : vector<1x16xf32>, vector<16x16xf32>, vector<1x16xf32> -> vector<1x16xf32>
    %cst_12 = arith.constant dense<0.000000e+00> : vector<1x16xf32>
    %30 = tpu.matmul %29, %27, %cst_12 {dimension_numbers = #tpu.dot_dimension_numbers<[1], [1], [0], [0], [0, 0, 1, 0], [], []>} : vector<1x16xf32>, vector<16x16xf32>, vector<1x16xf32> -> vector<1x16xf32>
    %31 = arith.addf %13, %30 : vector<1x16xf32>
    %32 = vector.extract_strided_slice %9 {offsets = [0, 16], sizes = [16, 16], strides = [1, 1]} : vector<16x64xf32> to vector<16x16xf32>
    %33 = vector.extract_strided_slice %10 {offsets = [0, 16], sizes = [16, 16], strides = [1, 1]} : vector<16x64xf32> to vector<16x16xf32>
    %34 = vector.extract_strided_slice %11 {offsets = [0, 16], sizes = [16, 16], strides = [1, 1]} : vector<16x64xf32> to vector<16x16xf32>
    %cst_13 = arith.constant dense<0.000000e+00> : vector<16x16xf32>
    %35 = tpu.matmul %32, %33, %cst_13 {dimension_numbers = #tpu.dot_dimension_numbers<[1], [1], [0], [0], [0, 0, 1, 0], [], []>} : vector<16x16xf32>, vector<16x16xf32>, vector<16x16xf32> -> vector<16x16xf32>
    %cst_14 = arith.constant dense<0xFF800000> : vector<16xf32>
    %36 = vector.multi_reduction <maximumf>, %35, %cst_14 [1] : vector<16x16xf32> to vector<16xf32>
    %37 = vector.shape_cast %36 : vector<16xf32> to vector<16x1xf32>
    %38 = vector.broadcast %37 : vector<16x1xf32> to vector<16x16xf32>
    %39 = arith.subf %35, %38 : vector<16x16xf32>
    %40 = math.exp %39 : vector<16x16xf32>
    %cst_15 = arith.constant dense<0.000000e+00> : vector<16xf32>
    %41 = vector.multi_reduction <add>, %40, %cst_15 [1] : vector<16x16xf32> to vector<16xf32>
    %42 = vector.shape_cast %41 : vector<16xf32> to vector<16x1xf32>
    %43 = tpu.reciprocal %42 {approx = true} : vector<16x1xf32> -> vector<16x1xf32>
    %44 = vector.broadcast %43 : vector<16x1xf32> to vector<16x16xf32>
    %45 = arith.mulf %40, %44 : vector<16x16xf32>
    %46 = vector.extract_strided_slice %12 {offsets = [0, 16], sizes = [1, 16], strides = [1, 1]} : vector<1x64xf32> to vector<1x16xf32>
    %cst_16 = arith.constant dense<0.000000e+00> : vector<1x16xf32>
    %47 = tpu.matmul %46, %34, %cst_16 {dimension_numbers = #tpu.dot_dimension_numbers<[1], [1], [0], [0], [0, 0, 1, 0], [], []>} : vector<1x16xf32>, vector<16x16xf32>, vector<1x16xf32> -> vector<1x16xf32>
    %cst_17 = arith.constant dense<0.000000e+00> : vector<1x16xf32>
    %48 = tpu.matmul %47, %45, %cst_17 {dimension_numbers = #tpu.dot_dimension_numbers<[1], [1], [0], [0], [0, 0, 1, 0], [], []>} : vector<1x16xf32>, vector<16x16xf32>, vector<1x16xf32> -> vector<1x16xf32>
    %49 = arith.addf %31, %48 : vector<1x16xf32>
    %50 = vector.extract_strided_slice %9 {offsets = [0, 32], sizes = [16, 16], strides = [1, 1]} : vector<16x64xf32> to vector<16x16xf32>
    %51 = vector.extract_strided_slice %10 {offsets = [0, 32], sizes = [16, 16], strides = [1, 1]} : vector<16x64xf32> to vector<16x16xf32>
    %52 = vector.extract_strided_slice %11 {offsets = [0, 32], sizes = [16, 16], strides = [1, 1]} : vector<16x64xf32> to vector<16x16xf32>
    %cst_18 = arith.constant dense<0.000000e+00> : vector<16x16xf32>
    %53 = tpu.matmul %50, %51, %cst_18 {dimension_numbers = #tpu.dot_dimension_numbers<[1], [1], [0], [0], [0, 0, 1, 0], [], []>} : vector<16x16xf32>, vector<16x16xf32>, vector<16x16xf32> -> vector<16x16xf32>
    %cst_19 = arith.constant dense<0xFF800000> : vector<16xf32>
    %54 = vector.multi_reduction <maximumf>, %53, %cst_19 [1] : vector<16x16xf32> to vector<16xf32>
    %55 = vector.shape_cast %54 : vector<16xf32> to vector<16x1xf32>
    %56 = vector.broadcast %55 : vector<16x1xf32> to vector<16x16xf32>
    %57 = arith.subf %53, %56 : vector<16x16xf32>
    %58 = math.exp %57 : vector<16x16xf32>
    %cst_20 = arith.constant dense<0.000000e+00> : vector<16xf32>
    %59 = vector.multi_reduction <add>, %58, %cst_20 [1] : vector<16x16xf32> to vector<16xf32>
    %60 = vector.shape_cast %59 : vector<16xf32> to vector<16x1xf32>
    %61 = tpu.reciprocal %60 {approx = true} : vector<16x1xf32> -> vector<16x1xf32>
    %62 = vector.broadcast %61 : vector<16x1xf32> to vector<16x16xf32>
    %63 = arith.mulf %58, %62 : vector<16x16xf32>
    %64 = vector.extract_strided_slice %12 {offsets = [0, 32], sizes = [1, 16], strides = [1, 1]} : vector<1x64xf32> to vector<1x16xf32>
    %cst_21 = arith.constant dense<0.000000e+00> : vector<1x16xf32>
    %65 = tpu.matmul %64, %52, %cst_21 {dimension_numbers = #tpu.dot_dimension_numbers<[1], [1], [0], [0], [0, 0, 1, 0], [], []>} : vector<1x16xf32>, vector<16x16xf32>, vector<1x16xf32> -> vector<1x16xf32>
    %cst_22 = arith.constant dense<0.000000e+00> : vector<1x16xf32>
    %66 = tpu.matmul %65, %63, %cst_22 {dimension_numbers = #tpu.dot_dimension_numbers<[1], [1], [0], [0], [0, 0, 1, 0], [], []>} : vector<1x16xf32>, vector<16x16xf32>, vector<1x16xf32> -> vector<1x16xf32>
    %67 = arith.addf %49, %66 : vector<1x16xf32>
    %68 = vector.extract_strided_slice %9 {offsets = [0, 48], sizes = [16, 16], strides = [1, 1]} : vector<16x64xf32> to vector<16x16xf32>
    %69 = vector.extract_strided_slice %10 {offsets = [0, 48], sizes = [16, 16], strides = [1, 1]} : vector<16x64xf32> to vector<16x16xf32>
    %70 = vector.extract_strided_slice %11 {offsets = [0, 48], sizes = [16, 16], strides = [1, 1]} : vector<16x64xf32> to vector<16x16xf32>
    %cst_23 = arith.constant dense<0.000000e+00> : vector<16x16xf32>
    %71 = tpu.matmul %68, %69, %cst_23 {dimension_numbers = #tpu.dot_dimension_numbers<[1], [1], [0], [0], [0, 0, 1, 0], [], []>} : vector<16x16xf32>, vector<16x16xf32>, vector<16x16xf32> -> vector<16x16xf32>
    %cst_24 = arith.constant dense<0xFF800000> : vector<16xf32>
    %72 = vector.multi_reduction <maximumf>, %71, %cst_24 [1] : vector<16x16xf32> to vector<16xf32>
    %73 = vector.shape_cast %72 : vector<16xf32> to vector<16x1xf32>
    %74 = vector.broadcast %73 : vector<16x1xf32> to vector<16x16xf32>
    %75 = arith.subf %71, %74 : vector<16x16xf32>
    %76 = math.exp %75 : vector<16x16xf32>
    %cst_25 = arith.constant dense<0.000000e+00> : vector<16xf32>
    %77 = vector.multi_reduction <add>, %76, %cst_25 [1] : vector<16x16xf32> to vector<16xf32>
    %78 = vector.shape_cast %77 : vector<16xf32> to vector<16x1xf32>
    %79 = tpu.reciprocal %78 {approx = true} : vector<16x1xf32> -> vector<16x1xf32>
    %80 = vector.broadcast %79 : vector<16x1xf32> to vector<16x16xf32>
    %81 = arith.mulf %76, %80 : vector<16x16xf32>
    %82 = vector.extract_strided_slice %12 {offsets = [0, 48], sizes = [1, 16], strides = [1, 1]} : vector<1x64xf32> to vector<1x16xf32>
    %cst_26 = arith.constant dense<0.000000e+00> : vector<1x16xf32>
    %83 = tpu.matmul %82, %70, %cst_26 {dimension_numbers = #tpu.dot_dimension_numbers<[1], [1], [0], [0], [0, 0, 1, 0], [], []>} : vector<1x16xf32>, vector<16x16xf32>, vector<1x16xf32> -> vector<1x16xf32>
    %cst_27 = arith.constant dense<0.000000e+00> : vector<1x16xf32>
    %84 = tpu.matmul %83, %81, %cst_27 {dimension_numbers = #tpu.dot_dimension_numbers<[1], [1], [0], [0], [0, 0, 1, 0], [], []>} : vector<1x16xf32>, vector<16x16xf32>, vector<1x16xf32> -> vector<1x16xf32>
    %85 = arith.addf %67, %84 : vector<1x16xf32>
    %c0_28 = arith.constant 0 : index
    %c0_29 = arith.constant 0 : index
    %86 = vector.load %arg5[%c0_28, %c0_29] : memref<1x1xf32, #tpu.memory_space<vmem>>, vector<1x1xf32>
    %87 = vector.broadcast %86 : vector<1x1xf32> to vector<1x16xf32>
    %88 = arith.addf %85, %87 : vector<1x16xf32>
    %c0_30 = arith.constant 0 : index
    %c0_31 = arith.constant 0 : index
    %c0_32 = arith.constant 0 : index
    %89 = vector.load %arg6[%c0_30, %c0_31, %c0_32] : memref<1x1x16xf32, #tpu.memory_space<vmem>>, vector<1x1x16xf32>
    %90 = vector.shape_cast %89 : vector<1x1x16xf32> to vector<1x16xf32>
    %91 = vector.shape_cast %88 : vector<1x16xf32> to vector<1x1x16xf32>
    tpu.vector_store %arg6[%c0_30, %c0_31, %c0_32], %91 {strides = array<i32>} : memref<1x1x16xf32, #tpu.memory_space<vmem>>, vector<1x1x16xf32>,
    return
  }
  func.func @transform_0(%arg0: i32) -> (i32, i32, i32) {
    %c0_i32 = arith.constant 0 : i32
    %c0_i32_0 = arith.constant 0 : i32
    %c0_i32_1 = arith.constant 0 : i32
    return %arg0, %c0_i32, %c0_i32_0 : i32, i32, i32
  }
  func.func @transform_1(%arg0: i32) -> (i32, i32) {
    %c0_i32 = arith.constant 0 : i32
    %c0_i32_0 = arith.constant 0 : i32
    %c0_i32_1 = arith.constant 0 : i32
    return %c0_i32, %c0_i32_0 : i32, i32
  }
  func.func @transform_2(%arg0: i32) -> (i32, i32) {
    %c0_i32 = arith.constant 0 : i32
    %c0_i32_0 = arith.constant 0 : i32
    %c0_i32_1 = arith.constant 0 : i32
    return %c0_i32, %c0_i32_0 : i32, i32
  }
  func.func @transform_3(%arg0: i32) -> (i32, i32) {
    %c0_i32 = arith.constant 0 : i32
    %c0_i32_0 = arith.constant 0 : i32
    %c0_i32_1 = arith.constant 0 : i32
    return %c0_i32, %c0_i32_0 : i32, i32
  }
  func.func @transform_4(%arg0: i32) -> (i32, i32) {
    %c0_i32 = arith.constant 0 : i32
    %c0_i32_0 = arith.constant 0 : i32
    %c0_i32_1 = arith.constant 0 : i32
    return %c0_i32, %c0_i32_0 : i32, i32
  }
  func.func @transform_5(%arg0: i32) -> (i32, i32, i32) {
    %c0_i32 = arith.constant 0 : i32
    %c0_i32_0 = arith.constant 0 : i32
    %c0_i32_1 = arith.constant 0 : i32
    return %arg0, %c0_i32, %c0_i32_0 : i32, i32, i32
  }
}

</mosaic_0001>

<bundles_post_ra>
// kernel: feature_self_attention.1
= control target key start
LH: loop header
LB: loop body
LE: loop exit
PB: predicated region body
PF: predicated region fallthrough
CT: control target
= control target key end

     0   :  { %s1267_s0 = inlined_call_operand.vmem [shape: f32[2,16,1], index: 0, kind: input, shape index: {}]   ;;  %s1268_s1 = inlined_call_operand.vmem [shape: f32[1,192], index: 1, kind: input, shape index: {}]   ;;  %s1269_s2 = inlined_call_operand.vmem [shape: f32[1,192], index: 2, kind: input, shape index: {}]   ;;  %s1270_s3 = inlined_call_operand.vmem [shape: f32[1,64], index: 3, kind: input, shape index: {}]   ;;  %s1271_s4 = inlined_call_operand.<no memory space> [shape: f32[1,1], index: 4, kind: input, shape index: {}]   ;;  %s1272_s5 = inlined_call_operand.hbm [shape: f32[2,1,16], index: 5, kind: output, shape index: {}]  }
   0x1   :  { %v10_v0 = vstv %s1271_s4 }
   0x2   :  { %11 = vst [vmem:[#allocation2] sm:$0x1] %v10_v0 }
   0x3   :  { %12 = vsyncpa [#allocation4], 0 }
   0x4   :  { %14 = vsyncpa [#allocation4 + $0x1], 0  ;;  %s1057_s20 = smov 0   ;;  %s1059_s21 = smov 0  }
   0x5   :  { %s1061_s22 = smov 0   ;;  %s1063_s23 = smov 0  }
   0x6 LB: > { %s1078_s4 = sadd.s32 4294967295, %s1014_s23   ;;  %s822_s24 = sadd.s32 4294967294, %s1014_s23   ;;  %s1014_s23 = sphi %s1063_s23, %s1278_s23   ;;  %s1010_s22 = sphi %s1061_s22, %s1277_s22   ;;  %s1006_s21 = sphi %s1059_s21, %s1276_s21   ;;  %s1002_s20 = sphi %s1057_s20, %s1275_s20  }
   0x7   : > { %s1082_s25 = sadd.s32 1, %s1014_s23   ;;  %s137_s26 = sadd.s32 1, %s1010_s22 }
   0x8   : > { %s134_s27 = ssub.s32 %s1014_s23, %s1082_s25  ;;  %p147_p0 = scmp.ne.s32.totalorder %s1010_s22, %s1006_s21 }
   0x9   : > { %p135_p1 = scmp.eq.s32.totalorder %s134_s27, 0  ;;  %p148_p2 = scmp.eq.s32.totalorder %s1078_s4, 1 }
   0xa   : > { %p153_p3 = scmp.ne.s32.totalorder %s1006_s21, %s1002_s20  ;;  %p154_p4 = scmp.eq.s32.totalorder %s822_s24, 1 }
   0xb   : > { %s1093_s28 = scalar_select %p135_p1, %s1010_s22, %s137_s26  }
   0xc   : > { %p1095_p5 = por %p148_p2, %p147_p0  ;;  %p1099_p6 = por %p154_p4, %p153_p3 }
   0xd   : > { %p825_p7 = scmp.ge.s32.totalorder %s1014_s23, 1  ;;  %p192_p8 = scmp.lt.s32.totalorder %s1014_s23, 3 }
   0xf   : > { %p193_p9 = pnand %p825_p7, %p192_p8 }
  0x10   : > { %p219_p10 = scmp.lt.s32.totalorder (!%p193_p9), %s1078_s4, 1  ;;  %s1017_s15 = smov (!%p193_p9), 48  }
  0x11   : > { %196 = sbr.rel (%p193_p9) target bundleno = 1221 (0x4c5), region = 40  ;;  %s1018_s16 = smov (!%p193_p9), 64  }
  0x12   : > { %s1019_s17 = smov (!%p193_p9), 112   ;;  %s1020_s24 = smov (!%p193_p9), 32  }
  0x13   : > { %s1023_s8 = smov (!%p193_p9), 96   ;;  %s217_s9 = sand.u32 (!%p193_p9), 1, %s1006_s21  }
  0x14   : > { %s763_s12 = scalar_lea.hbm (!%p193_p9), %s1272_s5, %s1078_s4  ;;  %s218_s13 = scalar_lea.vmem (!%p193_p9), [#allocation3], %s217_s9 }
  0x15   : > { %s765_s14 = sshll.u32 (!%p193_p9), %s218_s13, 4  ;;  %s766_s14 = int_to_ptr.vmem [resolvable:$true] %s765_s14 }
  0x16   : > { %v1016_v1 = vmov 0   ;;  %s220_s6 = scalar_select %p219_p10, %s1078_s4, 1  ;;  %v226_v4 = vld [vmem:[%s1268_s1] sm:$0x3]  ;;  %vm263_vm0 = vcmask 130048   ;;  %vm752_vm1 = vcmask 122880  }
  0x17   : > { %918 = vset.pattern.permute.xlu0 %v1016_v1  ;;  %v246_v5 = vld [vmem:[%s1269_s2] sm:$0x3]  ;;  %v238_v6 = vperm.slane %v226_v4, 0  ;;  %v239_v7 = vperm.slane %v226_v4, 1 }
  0x18   : > { %s870_s7 = sshll.u32 %s220_s6, 4  ;;  %v248_v8 = vperm.slane %v246_v5, 0  ;;  %v249_v9 = vperm.slane %v246_v5, 1  ;;  %v256_v28 = vld [vmem:[%s1270_s3] sm:$0x1]  ;;  %s1021_s6 = smov 16  }
  0x19   : > { %s223_s10 = scalar_lea.vmem %s1267_s0, %s870_s7  ;;  %v1163_v33 = vld [vmem:[%s1270_s3] ss:$0 sm:$0xff]  ;;  %s1022_s7 = smov 80  }
  0x1a   : > { %v225_v2 = vld [vmem:[%s223_s10 + $0x8] sm:$0xff]  ;;  %v224_v3 = vld [vmem:[%s223_s10] sm:$0xff] }
  0x1b   : > { %234 = vperm.xlu0 %918, %v225_v2  }
  0x23   : > { %229 = vperm.xlu0 %918, %v224_v3  }
  0x8d   : > { %v235_v10 = vpop.permute.xlu0 %234 }
  0x8e   : > { %v244_v11 = vmul.f32 %v238_v6, %v235_v10  ;;  %v245_v12 = vmul.f32 %v239_v7, %v235_v10 }
  0x90   : > { %v1116_v13 = vadd.f32 %v248_v8, %v244_v11  ;;  %v1118_v14 = vadd.f32 %v249_v9, %v245_v12 }
  0x92   : > { %832 = vmatpush.xpose.msk.msra.mxu1 %vm263_vm0, %v1118_v14  ;;  %352 = vrot.lane.b32.xlu2 %v1116_v13, %s1017_s15 }
  0x93   : > { %261 = vrot.lane.b32.xlu1 %v1116_v13, %s1018_s16 }
  0x95   : > { %v230_v15 = vpop.permute.xlu0 %229 }
  0x96   : > { %v242_v16 = vmul.f32 %v238_v6, %v230_v15  ;;  %v243_v17 = vmul.f32 %v239_v7, %v230_v15 }
  0x98   : > { %v1124_v18 = vadd.f32 %v248_v8, %v242_v16  ;;  %v1126_v19 = vadd.f32 %v249_v9, %v243_v17 }
  0x9a   : > { %833 = vmatpush.xpose.msk.msra.mxu1 %vm263_vm0, %v1126_v19  ;;  %346 = vrot.lane.b32.xlu0 %v1124_v18, %s1019_s17 }
  0x9b   : > { %350 = vrot.lane.b32.xlu2 %v1124_v18, %s1017_s15  ;;  %259 = vrot.lane.b32.xlu1 %v1124_v18, %s1018_s16  ;;  %s767_s15 = sshll.u32 %s763_s12, 4  ;;  %s755_s16 = scalar_lea.sflag [#allocation4], %s217_s9  ;;  %s768_s15 = int_to_ptr.hbm [resolvable:$true] %s767_s15 }
  0x9d   : > { %834 = vmatmul.msk.f32.vlgmr.msra.gmra.mxu1 %vm263_vm0, %v256_v28 }
  0xa3   : > { %348 = vrot.lane.b32.xlu1 %v1116_v13, %s1019_s17 }
  0xab   : > { %412 = vrot.lane.b32.xlu1 %v1118_v14, %s1019_s17 }
  0xb3   : > { %410 = vrot.lane.b32.xlu1 %v1126_v19, %s1019_s17 }
  0xec   : > { %v353_v20 = vpop.permute.xlu2 %352 }
  0xed   : > { %835 = vmatpush.xpose.msk.msra.mxu2 %vm263_vm0, %v353_v20 }
  0xf5   : > { %v351_v21 = vpop.permute.xlu2 %350 }
  0xf6   : > { %836 = vmatpush.xpose.msk.msra.mxu2 %vm263_vm0, %v351_v21 }
 0x105   : > { %v262_v22 = vpop.permute.xlu1 %261 }
 0x106   : > { %828 = vmatpush.xpose.msk.msra.mxu0 %vm263_vm0, %v262_v22 }
 0x10c   : > { %v347_v23 = vpop.permute.xlu0 %346 }
 0x10d   : > { %v260_v24 = vpop.permute.xlu1 %259  ;;  %837 = vmatmul.msk.f32.vlgmr.msra.gmra.mxu2 %vm263_vm0, %v347_v23 }
 0x10e   : > { %829 = vmatpush.xpose.msk.msra.mxu0 %vm263_vm0, %v260_v24 }
 0x111   : > { %830 = vmatmul.msk.f32.vlgmr.msra.gmra.mxu0 %vm263_vm0, %v1124_v18 }
 0x115   : > { %v349_v25 = vpop.permute.xlu1 %348 }
 0x116   : > { %838 = vmatmul.msk.f32.gmra.mxu2 %vm263_vm0, %v349_v25 }
 0x119   : > { %831 = vmatmul.msk.f32.gmra.mxu0 %vm263_vm0, %v1116_v13 }
 0x11a   : > { %v343_v58 = vpop.f32.mrf.mxu1 }
 0x11d   : > { %v413_v26 = vpop.permute.xlu1 %412 }
 0x11e   : > { %839 = vmatpush.xpose.msk.msra.mxu3 %vm263_vm0, %v413_v26 }
 0x125   : > { %v411_v27 = vpop.permute.xlu1 %410 }
 0x126   : > { %840 = vmatpush.xpose.msk.msra.mxu3 %vm263_vm0, %v411_v27 }
 0x18e   : > { %v289_v29 = vpop.f32.mrf.mxu0 }
 0x18f   : > { %v295_v30 = vsel %vm263_vm0, %v289_v29, -inf }
 0x190   : > { %296 = vmax.xlane.f32.xlu0 %v295_v30  ;;  %v379_v46 = vpop.f32.mrf.mxu2 }
 0x191   : > { %v385_v47 = vsel %vm263_vm0, %v379_v46, -inf }
 0x196   : > { %v292_v31 = vpop.f32.mrf.mxu0 }
 0x197   : > { %v298_v32 = vsel %vm263_vm0, %v292_v31, -inf }
 0x198   : > { %299 = vmax.xlane.f32.xlu2 %v298_v32 }
 0x199   : > { %v382_v48 = vpop.f32.mrf.mxu2 }
 0x19a   : > { %v388_v49 = vsel %vm263_vm0, %v382_v48, -inf }
 0x1a4   : > { %504 = vrot.lane.b32.xlu0 %v1116_v13, %s1020_s24 }
 0x1b0   : > { %408 = vrot.lane.b32.xlu2 %v1163_v33, %s1019_s17  ;;  %s966_s17 = sshra.s32 %s768_s15, 4  ;;  %s967_s17 = int_to_ptr.hbm [resolvable:$true] %s966_s17 }
 0x1b1   : > { %s968_s18 = scalar_lea.hbm %s967_s17, 1  ;;  %p973_p0 = scmp.lt.s32.totalorder %s967_s17, %s1272_s5 }
 0x1b2   : > { %p969_p11 = scmp.ne.s32.totalorder %s967_s17, %s968_s18 }
 0x1b4   : > { %p970_p12 = pnand %p969_p11, %p1095_p5 }
 0x1b6   : > { %p971_p13 = pneg %p970_p12 }
 0x1b8   : > { %627 = vrot.lane.b32.xlu2 %v1116_v13, %s1021_s6 }
 0x1c0   : > { %625 = vrot.lane.b32.xlu2 %v1124_v18, %s1021_s6 }
 0x1c8   : > { %621 = vrot.lane.b32.xlu2 %v1124_v18, %s1022_s7 }
 0x1d0   : > { %623 = vrot.lane.b32.xlu2 %v1116_v13, %s1022_s7 }
 0x1d8   : > { %561 = vrot.lane.b32.xlu2 %v1126_v19, %s1023_s8 }
 0x203   : > { %v297_v34 = vpop.xlane.xlu0 %296 }
 0x204   : > { %v301_v35 = vsub.f32 %v289_v29, %v297_v34 }
 0x206   : > { %v303_v36 = vmul.f32 1.442695, %v301_v35 }
 0x208   : > { %920 = vpow2.f32 %v303_v36 }
 0x20b   : > { %v300_v37 = vpop.xlane.xlu2 %299 }
 0x20c   : > { %v302_v38 = vsub.f32 %v292_v31, %v300_v37 }
 0x20e   : > { %v921_v39 = vpop.eup %920  ;;  %v305_v40 = vmul.f32 1.442695, %v302_v38 }
 0x20f   : > { %v307_v41 = vsel %vm263_vm0, %v921_v39, 0.0 }
 0x210   : > { %922 = vpow2.f32 %v305_v40  ;;  %308 = vadd.xlane.f32.xlu0 %v307_v41 }
 0x213   : > { %v409_v42 = vpop.permute.xlu2 %408 }
 0x214   : > { %841 = vmatmul.msk.f32.vlgmr.msra.gmra.mxu3 %vm263_vm0, %v409_v42 }
 0x216   : > { %v923_v43 = vpop.eup %922  ;;  %v505_v44 = vpop.permute.xlu0 %504 }
 0x217   : > { %848 = vmatpush.xpose.msk.msrb.mxu0 %vm263_vm0, %v505_v44  ;;  %v310_v45 = vsel %vm263_vm0, %v923_v43, 0.0 }
 0x218   : > { %311 = vadd.xlane.f32.xlu1 %v310_v45 }
 0x21b   : > { %v628_v52 = vpop.permute.xlu2 %627 }
 0x223   : > { %v626_v56 = vpop.permute.xlu2 %625 }
 0x224   : > { %498 = vrot.lane.b32.xlu0 %v1124_v18, %s1023_s8 }
 0x22b   : > { %v622_v59 = vpop.permute.xlu2 %621 }
 0x22c   : > { %500 = vrot.lane.b32.xlu0 %v1116_v13, %s1023_s8 }
 0x231   : > { %502 = vrot.lane.b32.xlu1 %v1124_v18, %s1020_s24  ;;  %s972_s24 = scalar_lea.hbm %s1272_s5, 2 }
 0x232   : > { %p974_p1 = scmp.lt.s32.totalorder %s972_s24, %s968_s18 }
 0x233   : > { %v624_v62 = vpop.permute.xlu2 %623 }
 0x234   : > { %p975_p2 = por %p974_p1, %p973_p0 }
 0x236   : > { %p976_p3 = pnand %p975_p2, %p971_p13 }
 0x256   : > { %386 = vmax.xlane.f32.xlu0 %v385_v47 }
 0x25b   : > { %389 = vmax.xlane.f32.xlu1 %v388_v49 }
 0x26a   : > { %563 = vrot.lane.b32.xlu0 %v1118_v14, %s1023_s8 }
 0x272   : > { %686 = vrot.lane.b32.xlu0 %v1118_v14, %s1022_s7 }
 0x27a   : > { %682 = vrot.lane.b32.xlu0 %v1163_v33, %s1022_s7 }
 0x283   : > { %v309_v50 = vpop.xlane.xlu0 %308 }
 0x28b   : > { %v312_v51 = vpop.xlane.xlu1 %311 }
 0x28c   : > { %924 = vrcp.f32 %v312_v51 }
 0x28d   : > { %926 = vrcp.f32 %v309_v50 }
 0x292   : > { %v925_v53 = vpop.eup %924 }
 0x293   : > { %v316_v54 = vmul.f32 %v925_v53, %v923_v43  ;;  %v927_v55 = vpop.eup %926 }
 0x294   : > { %v315_v57 = vmul.f32 %v927_v55, %v921_v39 }
 0x295   : > { %845 = vmatpush.xpose.msk.msrb.mxu3 %vm263_vm0, %v316_v54 }
 0x296   : > { %v499_v61 = vpop.permute.xlu0 %498 }
 0x297   : > { %v437_v10 = vpop.f32.mrf.mxu3 }
 0x299   : > { %846 = vmatpush.xpose.msk.msrb.mxu3 %vm263_vm0, %v315_v57 }
 0x29c   : > { %847 = vmatmul.msk.f32.vlgmr.msrb.gmra.mxu3 %vm263_vm0, %v343_v58 }
 0x29d   : > { %858 = vmatpush.xpose.msk.msra.mxu3 %vm263_vm0, %v628_v52  ;;  %v744_v52 = vld [vmem:[#allocation2] sm:$0x1] }
 0x29e   : > { %v501_v63 = vpop.permute.xlu0 %500 }
 0x2a1   : > { %859 = vmatpush.xpose.msk.msra.mxu3 %vm263_vm0, %v626_v56 }
 0x2a3   : > { %v503_v60 = vpop.permute.xlu1 %502 }
 0x2a4   : > { %849 = vmatpush.xpose.msk.msrb.mxu0 %vm263_vm0, %v503_v60  ;;  %860 = vmatmul.msk.f32.vlgmr.msra.gmra.mxu3 %vm263_vm0, %v622_v59 }
 0x2a7   : > { %850 = vmatmul.msk.f32.vlgmr.msrb.gmra.mxu0 %vm263_vm0, %v499_v61 }
 0x2ac   : > { %861 = vmatmul.msk.f32.gmra.mxu3 %vm263_vm0, %v624_v62 }
 0x2af   : > { %851 = vmatmul.msk.f32.gmra.mxu0 %vm263_vm0, %v501_v63 }
 0x2c9   : > { %v387_v0 = vpop.xlane.xlu0 %386 }
 0x2ca   : > { %v391_v1 = vsub.f32 %v379_v46, %v387_v0 }
 0x2cc   : > { %v393_v2 = vmul.f32 1.442695, %v391_v1 }
 0x2ce   : > { %928 = vpow2.f32 %v393_v2  ;;  %v390_v3 = vpop.xlane.xlu1 %389 }
 0x2cf   : > { %v392_v4 = vsub.f32 %v382_v48, %v390_v3 }
 0x2d1   : > { %v395_v5 = vmul.f32 1.442695, %v392_v4 }
 0x2d3   : > { %930 = vpow2.f32 %v395_v5 }
 0x2d4   : > { %v929_v6 = vpop.eup %928 }
 0x2d5   : > { %v397_v7 = vsel %vm263_vm0, %v929_v6, 0.0 }
 0x2d6   : > { %398 = vadd.xlane.f32.xlu1 %v397_v7 }
 0x2d9   : > { %v931_v8 = vpop.eup %930 }
 0x2da   : > { %v400_v9 = vsel %vm263_vm0, %v931_v8, 0.0 }
 0x2db   : > { %401 = vadd.xlane.f32.xlu2 %v400_v9 }
 0x2dc   : > { %v564_v26 = vpop.permute.xlu0 %563 }
 0x2e4   : > { %v687_v28 = vpop.permute.xlu0 %686 }
 0x2ec   : > { %v683_v31 = vpop.permute.xlu0 %682 }
 0x2ef   : > { %559 = vrot.lane.b32.xlu1 %v1163_v33, %s1023_s8 }
 0x2f3   : > { %684 = vrot.lane.b32.xlu2 %v1126_v19, %s1022_s7  ;;  %v562_v19 = vpop.permute.xlu2 %561 }
 0x31f   : > { %v1209_v11 = vpop.f32.mrf.mxu3 }
 0x324   : > { %v531_v12 = vpop.f32.mrf.mxu0 }
 0x325   : > { %v537_v13 = vsel %vm263_vm0, %v531_v12, -inf }
 0x326   : > { %538 = vmax.xlane.f32.xlu2 %v537_v13 }
 0x327   : > { %v654_v14 = vpop.f32.mrf.mxu3 }
 0x328   : > { %v660_v20 = vsel %vm263_vm0, %v654_v14, -inf }
 0x32c   : > { %v534_v15 = vpop.f32.mrf.mxu0 }
 0x32d   : > { %v540_v16 = vsel %vm263_vm0, %v534_v15, -inf }
 0x32e   : > { %541 = vmax.xlane.f32.xlu1 %v540_v16 }
 0x32f   : > { %v657_v17 = vpop.f32.mrf.mxu3 }
 0x330   : > { %v663_v18 = vsel %vm263_vm0, %v657_v17, -inf }
 0x331   : > { %664 = vmax.xlane.f32.xlu0 %v663_v18 }
 0x336   : > { %661 = vmax.xlane.f32.xlu1 %v660_v20 }
 0x349   : > { %v399_v21 = vpop.xlane.xlu1 %398 }
 0x34e   : > { %v402_v22 = vpop.xlane.xlu2 %401 }
 0x34f   : > { %932 = vrcp.f32 %v402_v22 }
 0x350   : > { %934 = vrcp.f32 %v399_v21 }
 0x355   : > { %v933_v23 = vpop.eup %932 }
 0x356   : > { %v406_v24 = vmul.f32 %v933_v23, %v931_v8  ;;  %v935_v25 = vpop.eup %934  ;;  %v685_v30 = vpop.permute.xlu2 %684 }
 0x357   : > { %v405_v27 = vmul.f32 %v935_v25, %v929_v6 }
 0x358   : > { %842 = vmatpush.xpose.msk.msrb.mxu1 %vm263_vm0, %v406_v24 }
 0x35c   : > { %843 = vmatpush.xpose.msk.msrb.mxu1 %vm263_vm0, %v405_v27 }
 0x35f   : > { %844 = vmatmul.msk.f32.vlgmr.msrb.gmra.mxu1 %vm263_vm0, %v437_v10 }
 0x360   : > { %852 = vmatpush.xpose.msk.msra.mxu1 %vm263_vm0, %v564_v26 }
 0x361   : > { %v560_v29 = vpop.permute.xlu1 %559 }
 0x364   : > { %853 = vmatpush.xpose.msk.msra.mxu1 %vm263_vm0, %v562_v19 }
 0x367   : > { %854 = vmatmul.msk.f32.vlgmr.msra.gmra.mxu1 %vm263_vm0, %v560_v29 }
 0x368   : > { %862 = vmatpush.xpose.msk.msrb.mxu1 %vm263_vm0, %v687_v28 }
 0x36c   : > { %863 = vmatpush.xpose.msk.msrb.mxu1 %vm263_vm0, %v685_v30 }
 0x36f   : > { %864 = vmatmul.msk.f32.vlgmr.msrb.gmra.mxu1 %vm263_vm0, %v683_v31 }
 0x399   : > { %v539_v32 = vpop.xlane.xlu2 %538 }
 0x39a   : > { %v543_v33 = vsub.f32 %v531_v12, %v539_v32 }
 0x39c   : > { %v545_v34 = vmul.f32 1.442695, %v543_v33 }
 0x39e   : > { %936 = vpow2.f32 %v545_v34 }
 0x3a1   : > { %v542_v35 = vpop.xlane.xlu1 %541 }
 0x3a2   : > { %v544_v36 = vsub.f32 %v534_v15, %v542_v35 }
 0x3a4   : > { %v937_v37 = vpop.eup %936  ;;  %v547_v38 = vmul.f32 1.442695, %v544_v36  ;;  %v665_v39 = vpop.xlane.xlu0 %664 }
 0x3a5   : > { %v667_v40 = vsub.f32 %v657_v17, %v665_v39  ;;  %v549_v41 = vsel %vm263_vm0, %v937_v37, 0.0 }
 0x3a6   : > { %938 = vpow2.f32 %v547_v38  ;;  %550 = vadd.xlane.f32.xlu0 %v549_v41 }
 0x3a7   : > { %v670_v42 = vmul.f32 1.442695, %v667_v40 }
 0x3a9   : > { %940 = vpow2.f32 %v670_v42  ;;  %v662_v43 = vpop.xlane.xlu1 %661 }
 0x3aa   : > { %v666_v44 = vsub.f32 %v654_v14, %v662_v43 }
 0x3ac   : > { %v939_v45 = vpop.eup %938  ;;  %v668_v46 = vmul.f32 1.442695, %v666_v44 }
 0x3ad   : > { %v552_v47 = vsel %vm263_vm0, %v939_v45, 0.0 }
 0x3ae   : > { %942 = vpow2.f32 %v668_v46  ;;  %553 = vadd.xlane.f32.xlu2 %v552_v47 }
 0x3af   : > { %v941_v48 = vpop.eup %940 }
 0x3b0   : > { %v675_v49 = vsel %vm263_vm0, %v941_v48, 0.0 }
 0x3b1   : > { %676 = vadd.xlane.f32.xlu1 %v675_v49 }
 0x3b4   : > { %v943_v50 = vpop.eup %942 }
 0x3b5   : > { %v672_v51 = vsel %vm263_vm0, %v943_v50, 0.0 }
 0x3b6   : > { %673 = vadd.xlane.f32.xlu2 %v672_v51 }
 0x3ba   : > { %747 = vperm.xlu0 %918, %v744_v52  }
 0x3dc   : > { %v466_v56 = vpop.f32.mrf.mxu1 }
 0x3dd   : > { %v496_v5 = vadd.f32 %v1209_v11, %v466_v56 }
 0x3e4   : > { %v588_v0 = vpop.f32.mrf.mxu1 }
 0x3ec   : > { %v711_v3 = vpop.f32.mrf.mxu1 }
 0x419   : > { %v551_v53 = vpop.xlane.xlu0 %550 }
 0x421   : > { %v554_v54 = vpop.xlane.xlu2 %553 }
 0x422   : > { %944 = vrcp.f32 %v554_v54 }
 0x423   : > { %946 = vrcp.f32 %v551_v53 }
 0x424   : > { %v677_v55 = vpop.xlane.xlu1 %676 }
 0x425   : > { %948 = vrcp.f32 %v677_v55 }
 0x428   : > { %v945_v57 = vpop.eup %944 }
 0x429   : > { %v674_v58 = vpop.xlane.xlu2 %673  ;;  %v558_v59 = vmul.f32 %v945_v57, %v939_v45  ;;  %v947_v60 = vpop.eup %946 }
 0x42a   : > { %950 = vrcp.f32 %v674_v58  ;;  %v557_v62 = vmul.f32 %v947_v60, %v937_v37 }
 0x42b   : > { %v949_v61 = vpop.eup %948  ;;  %855 = vmatpush.xpose.msk.msrb.mxu2 %vm263_vm0, %v558_v59 }
 0x42c   : > { %v681_v63 = vmul.f32 %v949_v61, %v941_v48  ;;  %v748_v6 = vpop.permute.xlu0 %747 }
 0x42d   : > { %v750_v9 = vperm.slane %v748_v6, 0 }
 0x42f   : > { %856 = vmatpush.xpose.msk.msrb.mxu2 %vm263_vm0, %v557_v62 }
 0x430   : > { %v951_v1 = vpop.eup %950 }
 0x431   : > { %v680_v2 = vmul.f32 %v951_v1, %v943_v50 }
 0x432   : > { %857 = vmatmul.msk.f32.vlgmr.msrb.gmra.mxu2 %vm263_vm0, %v588_v0 }
 0x433   : > { %865 = vmatpush.xpose.msk.msra.mxu2 %vm263_vm0, %v681_v63 }
 0x437   : > { %866 = vmatpush.xpose.msk.msra.mxu2 %vm263_vm0, %v680_v2 }
 0x43a   : > { %867 = vmatmul.msk.f32.vlgmr.msra.gmra.mxu2 %vm263_vm0, %v711_v3 }
 0x4b5   : > { %v617_v4 = vpop.f32.mrf.mxu2 }
 0x4b6   : > { %v620_v7 = vadd.f32 %v617_v4, %v496_v5 }
 0x4bd   : > { %v740_v8 = vpop.f32.mrf.mxu2 }
 0x4be   : > { %v743_v10 = vadd.f32 %v740_v8, %v620_v7 }
 0x4c0   : > { %v751_v12 = vadd.f32 %v750_v9, %v743_v10 }
 0x4c2   : > { %753 = vst.msk [vmem:[%s218_s13] sm:$0x1] %vm752_vm1, %v751_v12 }
 0x4c3   : > { %979 = shalt.err (!%p976_p3)
}
 0x4c4   : > { %871 = dma.vmem_to_hbm [thread:$0]  (%p1095_p5), %s766_s14, 16, %s768_s15, %s755_s16  }
 0x4c5 PF: > { %p877_p4 = scmp.ge.s32.totalorder %s1014_s23, 2  ;;  %s779_s6 = sand.u32 1, %s1002_s20  }
 0x4c6   : > { %s780_s7 = scalar_lea.sflag [#allocation4], %s779_s6 }
 0x4c7   : > { %p874_p7 = pnand %p877_p4, %p1099_p6 }
 0x4c9   : > { %p875_p8 = pneg %p874_p7 }
 0x4cb   : > { %997 = dma.done.wait (%p875_p8), %s780_s7, 16  }
 0x4cc   : > { %999 = vsyncadd (%p875_p8), %s780_s7, 4294967280  ;;  %p17_p9 = scmp.ge.s32.totalorder %s1082_s25, 4   ;;  %s1275_s20 = smov %s1006_s21 }
 0x4cd   : > { %s1276_s21 = smov %s1010_s22  ;;  %s1277_s22 = smov %s1093_s28 }
 0x4ce   : > { %s1278_s23 = smov %s1082_s25  ;;  %19 = sbr.rel (!%p17_p9) target bundleno = 6 (0x6), region = 75 }
 0x4d3   :  { %785 = vsyncpa [#allocation4], 1 }
 0x4d4   :  { %787 = vsyncpa [#allocation4 + $0x1], 1 }

</bundles_post_ra>
